<compile_context>
chip_gen: v7x
topology: tpu7x:2x2x1
jax: 0.10.0
libtpu: 0.0.40
codegen_flags: <defaults>
</compile_context>

<pallas_src>
import functools

import jax
import jax.numpy as jnp
from jax.experimental import pallas as pl
from jax.experimental.pallas import tpu as pltpu


def _row_ssq_kernel(g_ref, ssq_ref, *, d_total, td, ragged, lane_dense):
    """Per-row sum-of-squares accumulation.

    g_ref:   (tr, td) tile of flattened gradient rows (any float dtype).
    ssq_ref: (tr, 128) [or (tr, 1) if td is not lane-aligned] f32 output block;
             same block for every k, so it stays VMEM-resident across the
             reduction axis and acts as the accumulator (P3 pattern).
    Grid: (r, k) = (row tile, feature-dim reduction step).
    """
    k = pl.program_id(1)

    @pl.when(k == 0)
    def _():
        ssq_ref[...] = jnp.zeros_like(ssq_ref)

    g = g_ref[...].astype(jnp.float32)  # bf16 in -> f32 accumulate

    if ragged:
        # Zero out-of-range lanes of the tail tile BEFORE squaring: stale VMEM
        # garbage there could be Inf/NaN.
        lane = jax.lax.broadcasted_iota(jnp.int32, g.shape, 1)
        g = jnp.where(lane < (d_total - k * td), g, 0.0)

    sq = g * g

    if lane_dense:
        # Fold the td/128 lane chunks with pure vreg adds (no XLU, no masked
        # stores); the final cross-lane reduce happens in the wrapper.
        part = sq[:, 0:128]
        for c in range(1, td // 128):
            part = part + sq[:, c * 128:(c + 1) * 128]
    else:
        # td == full (non-128-aligned) D: single lane reduce per row tile.
        part = jnp.sum(sq, axis=1, keepdims=True)

    ssq_ref[...] += part


def _round_up(x: int, m: int) -> int:
    return ((x + m - 1) // m) * m


def _round_down(x: int, m: int) -> int:
    return (x // m) * m


def gradient_penalty_from_grads(
    grads_flat: jax.Array,
    *,
    target_block_bytes: int = 8 * 1024 * 1024,   # 8 MiB default; 8-16 MiB good on v7x
    max_lane_tile: int = 8192,                    # wide lane tile first (>=32 KiB/row f32)
    input_buffers: int = 2,                       # set 3 (pl.Buffered) if DMA is exposed
    core_parallel: bool = False,                  # set True on v7x (2 TC/chip)
    vmem_limit_bytes: int = 48 * 1024 * 1024,
) -> jax.Array:
    """grads_flat: (B, D) float array (f32 or bf16) of per-sample flattened gradients."""
    B, D = grads_flat.shape
    itemsize = jnp.dtype(grads_flat.dtype).itemsize

    # --- lane (feature) tile: wide, with minimal over-read on the ragged tail ---
    if D <= max_lane_tile:
        td, kd = D, 1                       # full extent (allowed even if not %128)
    else:
        kd = pl.cdiv(D, max_lane_tile)
        td = _round_up(pl.cdiv(D, kd), 128)  # balance tiles -> tail nearly full
        kd = pl.cdiv(D, td)
    ragged = (kd > 1) and (D % td != 0)
    lane_dense = (td % 128 == 0)
    ow = 128 if lane_dense else 1

    # --- row tile: fill the byte budget; bounds VMEM for huge batches ---
    tr_budget = max(1, target_block_bytes // (td * itemsize))
    if B <= tr_budget:
        tr = B                               # full extent (allowed even if not %8)
    else:
        tr = max(8, _round_down(tr_budget, 8))
        if tr >= B:
            tr = B
    nr = pl.cdiv(B, tr)

    in_spec_kwargs = {}
    if input_buffers > 2:
        in_spec_kwargs["pipeline_mode"] = pl.Buffered(input_buffers)
    in_spec = pl.BlockSpec((tr, td), lambda r, k: (r, k), **in_spec_kwargs)

    row_sem = pltpu.CORE_PARALLEL if core_parallel else "parallel"
    kernel = functools.partial(
        _row_ssq_kernel, d_total=D, td=td, ragged=ragged, lane_dense=lane_dense)

    partial_ssq = pl.pallas_call(
        kernel,
        out_shape=jax.ShapeDtypeStruct((B, ow), jnp.float32),
        grid_spec=pltpu.PrefetchScalarGridSpec(
            num_scalar_prefetch=0,
            grid=(nr, kd),                               # reduction axis last
            in_specs=[in_spec],
            out_specs=pl.BlockSpec((tr, ow), lambda r, k: (r, 0)),
        ),
        compiler_params=pltpu.CompilerParams(
            dimension_semantics=(row_sem, "arbitrary"),
            vmem_limit_bytes=vmem_limit_bytes,
        ),
    )(grads_flat)

    # Tiny epilogue (O(B*128) elements): cross-lane fold, norm, penalty, mean.
    ssq = jnp.sum(partial_ssq, axis=1)
    norm = jnp.sqrt(ssq)
    return jnp.mean((norm - 1.0) ** 2)


def functional_gp(inputs: jax.Array, y_pred_fn) -> jax.Array:
    """JAX equivalent of the PyTorch functional_gp.

    torch.autograd.grad(y_pred, inputs, grad_outputs=ones_like(y_pred)) is the
    VJP of the graph producing y_pred with a cotangent of ones, so here the
    graph is passed explicitly as the function `y_pred_fn`.
    """
    # TODO(synk): torch.autograd.grad on an already-built graph (the y_pred
    # tensor) has no Pallas/JAX equivalent; the producing function is required.
    y_pred, vjp_fn = jax.vjp(y_pred_fn, inputs)
    grads = vjp_fn(jnp.ones_like(y_pred))[0]          # same shape as inputs (NCHW)
    grads_flat = grads.reshape(grads.shape[0], -1)    # flatten(start_dim=1)
    return gradient_penalty_from_grads(grads_flat)


class GradientPenalty:
    """Stateless module mirroring the PyTorch GradientPenalty."""

    def __call__(self, inputs: jax.Array, y_pred_fn) -> jax.Array:
        return functional_gp(inputs, y_pred_fn)


if __name__ == "__main__":
    key = jax.random.PRNGKey(0)
    B, C, H, W = 2, 4, 16, 16            # NCHW, like PyTorch
    D = C * H * W

    x = jax.random.normal(key, (B, C, H, W), dtype=jnp.float32)

    # Deterministic synthetic "discriminator" connecting inputs -> y_pred
    # (the GradientPenalty module itself has no parameters).
    w = ((jnp.arange(D, dtype=jnp.float32) % 7) - 3.0) / (8.0 * jnp.sqrt(float(D)))

    def disc(inp):
        return inp.reshape(inp.shape[0], -1) @ w     # y_pred: (B,)

    gp_module = GradientPenalty()
    gp = jax.block_until_ready(gp_module(x, disc))

    # Pure-JAX reference (f32 path).
    y, vjp_fn = jax.vjp(disc, x)
    g_ref = vjp_fn(jnp.ones_like(y))[0].reshape(B, -1)
    ref = jnp.mean((jnp.linalg.norm(g_ref, axis=1) - 1.0) ** 2)
    assert abs(float(gp) - float(ref)) <= 1e-5 * max(1.0, abs(float(ref))), (
        float(gp), float(ref))

    # Ragged-D + row-tiled path: forces kd>1, tail masking, and a partial
    # row-edge block (B=100 not a multiple of the 64-row tile, D=1000 not a
    # multiple of the 256-lane tile).  No padding copies are made.
    g2 = jax.random.normal(jax.random.PRNGKey(1), (100, 1000), dtype=jnp.float32)
    gp2 = jax.block_until_ready(
        gradient_penalty_from_grads(g2, target_block_bytes=64 * 1024,
                                    max_lane_tile=256))
    ref2 = jnp.mean((jnp.linalg.norm(g2, axis=1) - 1.0) ** 2)
    assert abs(float(gp2) - float(ref2)) <= 1e-4 * max(1.0, abs(float(ref2))), (
        float(gp2), float(ref2))

    # bf16 gradient path (halves HBM traffic; kernel accumulates in f32).
    g_bf16 = g_ref.astype(jnp.bfloat16)
    gp_bf16 = jax.block_until_ready(gradient_penalty_from_grads(g_bf16))
    ref_bf16 = jnp.mean(
        (jnp.linalg.norm(g_bf16.astype(jnp.float32), axis=1) - 1.0) ** 2)
    assert abs(float(gp_bf16) - float(ref_bf16)) <= 1e-3 * max(1.0, abs(float(ref_bf16))), (
        float(gp_bf16), float(ref_bf16))

    print("KERNEL_OK")
</pallas_src>

<mosaic_0001>
module attributes {stable_mosaic.version = 11 : i64} {
  func.func @_row_ssq_kernel(%arg0: i32, %arg1: i32, %arg2: memref<2x1024xf32, #tpu.memory_space<vmem>>, %arg3: memref<2x128xf32, #tpu.memory_space<vmem>>) attributes {dimension_semantics = [#tpu.dimension_semantics<parallel>, #tpu.dimension_semantics<arbitrary>], iteration_bounds = array<i64: 1, 1>, scalar_prefetch = 0 : i64, scratch_operands = 0 : i64, tpu.core_type = #tpu.core_type<tc>, window_params = [{transform_indices = @transform_0, window_bounds = array<i64: 2, 1024>}, {transform_indices = @transform_1, window_bounds = array<i64: 2, 128>}]} {
    %c0_i32 = arith.constant 0 : i32
    %0 = arith.cmpi eq, %arg1, %c0_i32 : i32
    %1 = arith.extui %0 : i1 to i32
    %c0_i32_0 = arith.constant 0 : i32
    %2 = arith.cmpi ne, %1, %c0_i32_0 : i32
    scf.if %2 {
      %cst = arith.constant 0.000000e+00 : f32
      %23 = vector.broadcast %cst : f32 to vector<2x128xf32>
      %c0_6 = arith.constant 0 : index
      %c0_7 = arith.constant 0 : index
      %24 = vector.load %arg3[%c0_6, %c0_7] : memref<2x128xf32, #tpu.memory_space<vmem>>, vector<2x128xf32>
      tpu.vector_store %arg3[%c0_6, %c0_7], %23 {strides = array<i32>} : memref<2x128xf32, #tpu.memory_space<vmem>>, vector<2x128xf32>,
    } else {
    }
    %c0 = arith.constant 0 : index
    %c0_1 = arith.constant 0 : index
    %3 = vector.load %arg2[%c0, %c0_1] : memref<2x1024xf32, #tpu.memory_space<vmem>>, vector<2x1024xf32>
    %4 = arith.mulf %3, %3 : vector<2x1024xf32>
    %5 = vector.extract_strided_slice %4 {offsets = [0, 0], sizes = [2, 128], strides = [1, 1]} : vector<2x1024xf32> to vector<2x128xf32>
    %6 = vector.extract_strided_slice %4 {offsets = [0, 128], sizes = [2, 128], strides = [1, 1]} : vector<2x1024xf32> to vector<2x128xf32>
    %7 = arith.addf %5, %6 : vector<2x128xf32>
    %8 = vector.extract_strided_slice %4 {offsets = [0, 256], sizes = [2, 128], strides = [1, 1]} : vector<2x1024xf32> to vector<2x128xf32>
    %9 = arith.addf %7, %8 : vector<2x128xf32>
    %10 = vector.extract_strided_slice %4 {offsets = [0, 384], sizes = [2, 128], strides = [1, 1]} : vector<2x1024xf32> to vector<2x128xf32>
    %11 = arith.addf %9, %10 : vector<2x128xf32>
    %12 = vector.extract_strided_slice %4 {offsets = [0, 512], sizes = [2, 128], strides = [1, 1]} : vector<2x1024xf32> to vector<2x128xf32>
    %13 = arith.addf %11, %12 : vector<2x128xf32>
    %14 = vector.extract_strided_slice %4 {offsets = [0, 640], sizes = [2, 128], strides = [1, 1]} : vector<2x1024xf32> to vector<2x128xf32>
    %15 = arith.addf %13, %14 : vector<2x128xf32>
    %16 = vector.extract_strided_slice %4 {offsets = [0, 768], sizes = [2, 128], strides = [1, 1]} : vector<2x1024xf32> to vector<2x128xf32>
    %17 = arith.addf %15, %16 : vector<2x128xf32>
    %18 = vector.extract_strided_slice %4 {offsets = [0, 896], sizes = [2, 128], strides = [1, 1]} : vector<2x1024xf32> to vector<2x128xf32>
    %19 = arith.addf %17, %18 : vector<2x128xf32>
    %c0_2 = arith.constant 0 : index
    %c0_3 = arith.constant 0 : index
    %20 = vector.load %arg3[%c0_2, %c0_3] : memref<2x128xf32, #tpu.memory_space<vmem>>, vector<2x128xf32>
    %21 = arith.addf %20, %19 : vector<2x128xf32>
    %c0_4 = arith.constant 0 : index
    %c0_5 = arith.constant 0 : index
    %22 = vector.load %arg3[%c0_4, %c0_5] : memref<2x128xf32, #tpu.memory_space<vmem>>, vector<2x128xf32>
    tpu.vector_store %arg3[%c0_4, %c0_5], %21 {strides = array<i32>} : memref<2x128xf32, #tpu.memory_space<vmem>>, vector<2x128xf32>,
    return
  }
  func.func @transform_0(%arg0: i32, %arg1: i32) -> (i32, i32) {
    %c0_i32 = arith.constant 0 : i32
    return %arg0, %arg1 : i32, i32
  }
  func.func @transform_1(%arg0: i32, %arg1: i32) -> (i32, i32) {
    %c0_i32 = arith.constant 0 : i32
    %c0_i32_0 = arith.constant 0 : i32
    return %arg0, %c0_i32 : i32, i32
  }
}

</mosaic_0001>

<bundles_post_ra>
// kernel: tpu_custom_call.1
= control target key start
LH: loop header
LB: loop body
LE: loop exit
PB: predicated region body
PF: predicated region fallthrough
CT: control target
= control target key end

     0   :  { %6 = vsyncpa [#allocation3], 0  ;;  %s157_s0 = inlined_call_operand.hbm [shape: f32[2,1024], index: 0, kind: input, shape index: {}]   ;;  %s158_s1 = inlined_call_operand.hbm [shape: f32[2,128], index: 1, kind: output, shape index: {}]  }
   0x1   :  { %7 = vsyncpa [#allocation4], 0  ;;  %s120_s6 = smov [#allocation2]   ;;  %s72_s10 = scalar_lea.hbm %s157_s0, 256 }
   0x2   :  { %s14_s7 = sshll.u32 %s120_s6, 4  ;;  %p73_p0 = scmp.ne.s32.totalorder %s157_s0, %s72_s10  ;;  %s15_s7 = int_to_ptr.vmem [resolvable:$true] %s14_s7 }
   0x3   :  { %p76_p1 = scmp.lt.u32.totalorder %s72_s10, %s157_s0 }
   0x5   :  { %p78_p2 = pnand %p76_p1, %p73_p0 }
   0x7   :  { %81 = shalt.err (!%p78_p2)
}
   0x8   :  { %s82_s15 = scalar_lea.vmem %s15_s7, 256  ;;  %p87_p4 = scmp.lt.s32.totalorder %s15_s7, %s15_s7 }
   0x9   :  { %p83_p3 = scmp.ne.s32.totalorder %s15_s7, %s82_s15  ;;  %p88_p5 = scmp.lt.s32.totalorder %s82_s15, %s82_s15 }
   0xb   :  { %p89_p6 = por %p88_p5, %p87_p4 }
   0xd   :  { %p90_p7 = pnand %p89_p6, %p83_p3 }
   0xf   :  { %93 = shalt.err (!%p90_p7)
}
  0x10   :  { %17 = dma.hbm_to_vmem [thread:$0]  %s157_s0, 256, %s15_s7, [#allocation3]  }
  0x11   :  { %116 = dma.done.wait [#allocation3], 256  }
  0x12   :  { %117 = vsyncadd [#allocation3], 4294967040  ;;  %v121_v0 = vmov 0.0   ;;  %v26_v1 = vld [vmem:[#allocation2] sm:$0xff]  ;;  %v27_v3 = vld [vmem:[#allocation2 + $0x8] sm:$0xff]  ;;  %s122_s0 = smov [#allocation5]  }
  0x13   :  { %25 = vst [vmem:[#allocation5] sm:$0x3] %v121_v0  ;;  %v28_v2 = vmul.f32 %v26_v1, %v26_v1  ;;  %v29_v6 = vmul.f32 %v27_v3, %v27_v3  ;;  %s60_s18 = sshll.u32 %s122_s0, 4  ;;  %s61_s18 = int_to_ptr.vmem [resolvable:$true] %s60_s18 }
  0x14   :  { %s94_s19 = scalar_lea.vmem %s61_s18, 32  ;;  %p99_p9 = scmp.lt.s32.totalorder %s61_s18, %s61_s18 }
  0x15   :  { %v31_v4 = vrot.slane %v28_v2, 2  ;;  %v34_v5 = vrot.slane %v28_v2, 4  ;;  %v37_v8 = vrot.slane %v28_v2, 6  ;;  %v42_v11 = vrot.slane %v29_v6, 2  ;;  %p95_p8 = scmp.ne.s32.totalorder %s61_s18, %s94_s19  ;;  %p100_p10 = scmp.lt.s32.totalorder %s94_s19, %s94_s19 }
  0x16   :  { %v45_v13 = vrot.slane %v29_v6, 4  ;;  %v48_v15 = vrot.slane %v29_v6, 6 }
  0x17   :  { %v33_v7 = vadd.f32 %v31_v4, %v28_v2  ;;  %p101_p11 = por %p100_p10, %p99_p9 }
  0x19   :  { %v36_v9 = vadd.f32 %v34_v5, %v33_v7  ;;  %p102_p12 = pnand %p101_p11, %p95_p8 }
  0x1a   :  { %v51_v17 = vld [vmem:[#allocation5] sm:$0x3] }
  0x1b   :  { %v39_v10 = vadd.f32 %v37_v8, %v36_v9 }
  0x1d   :  { %v40_v12 = vadd.f32 %v39_v10, %v29_v6 }
  0x1f   :  { %v44_v14 = vadd.f32 %v42_v11, %v40_v12 }
  0x21   :  { %v47_v16 = vadd.f32 %v45_v13, %v44_v14 }
  0x23   :  { %v50_v18 = vadd.f32 %v48_v15, %v47_v16 }
  0x25   :  { %v52_v19 = vadd.f32 %v51_v17, %v50_v18 }
  0x27   :  { %53 = vst [vmem:[#allocation5] sm:$0x3] %v52_v19 }
  0x28   :  { %105 = shalt.err (!%p102_p12)
}
  0x29   :  { %s106_s22 = scalar_lea.hbm %s158_s1, 32 }
  0x2a   :  { %p107_p13 = scmp.ne.s32.totalorder %s158_s1, %s106_s22  ;;  %p110_p0 = scmp.lt.u32.totalorder %s106_s22, %s158_s1 }
  0x2c   :  { %p112_p1 = pnand %p110_p0, %p107_p13 }
  0x2e   :  { %115 = shalt.err (!%p112_p1)
}
  0x2f   :  { %63 = dma.vmem_to_hbm [thread:$0]  %s61_s18, 32, %s158_s1, [#allocation4]  }
  0x30   :  { %118 = dma.done.wait [#allocation4], 32  }
  0x31   :  { %119 = vsyncadd [#allocation4], 4294967264 }
  0x32   :  { %67 = vsyncpa [#allocation3], 1 }
  0x33   :  { %68 = vsyncpa [#allocation4], 1 }

</bundles_post_ra>
